<compile_context>
chip_gen: v5e
topology: v5e:2x2
jax: 0.10.0
libtpu: 0.0.40
codegen_flags: <defaults>
</compile_context>

<pallas_src>
import jax
import jax.numpy as jnp
from jax import lax
from jax.experimental import pallas as pl
from jax.experimental.pallas import tpu as pltpu

BN_EPS = 1e-5
LEAKY_SLOPE = 0.2


def _leaky_relu(h):
    return jnp.where(h > 0, h, LEAKY_SLOPE * h)


def _bn_scale_shift(h_all, gamma, beta, n_batch):
    """Training-mode BatchNorm1d folded into a per-feature (scale, shift).

    h_all: (T, feat, tile_b) pre-activations for the WHOLE batch (features on
    sublanes, batch on lanes).  Two-pass (h - mu)^2 variance (biased, 1/N),
    all in f32; rsqrt goes to the EUP slot.
    """
    inv_n = 1.0 / float(n_batch)
    mu = jnp.sum(jnp.sum(h_all, axis=0), axis=1, keepdims=True) * inv_n   # (feat, 1)
    d = h_all - mu[None]
    var = jnp.sum(jnp.sum(d * d, axis=0), axis=1, keepdims=True) * inv_n  # (feat, 1)
    s = gamma * lax.rsqrt(var + BN_EPS)
    return s, beta - mu * s


def heatmap_disc_kernel(x_ref, w1_ref, w2_ref, pvec_ref, o_ref,
                        h1_ref, h2_ref, s1_ref, t1_ref, s2_ref, t2_ref):
    # x_ref : (c_in, tile_b) bf16   (batch on lanes)
    # w1_ref: (c_m, c_in)    bf16   (resident)
    # w2_ref: (c_q, c_m)     bf16   (resident)
    # pvec  : (c_m, 8)       f32    packed small params (resident)
    # o_ref : (1, tile_b)    f32    lane-dense output tile
    # h1/h2 : (T, c_m/c_q, tile_b) f32 whole-batch activation stash (VMEM)
    # s*/t* : folded BN scale/shift scratch
    ph = pl.program_id(0)          # 0: layer-1, 1: BN1+layer-2, 2: BN2+layer-3
    t = pl.program_id(1)           # batch tile index
    n_b = h1_ref.shape[0] * h1_ref.shape[2]   # static: global batch size
    c_q = w2_ref.shape[0]
    p = pvec_ref[...]

    # ---- phase 0: Linear(c_in, c_m, bias=False) ---------------------------
    @pl.when(ph == 0)
    def _():
        h1_ref[t] = jnp.dot(w1_ref[...], x_ref[...],
                            preferred_element_type=jnp.float32)
        o_ref[...] = jnp.zeros_like(o_ref)       # keep out buffer defined

    # ---- phase 1: global-batch BN1 + LeakyReLU + Linear(c_m, c_q) ---------
    @pl.when(ph == 1)
    def _():
        @pl.when(t == 0)
        def _():                                 # stats once per phase
            s, sh = _bn_scale_shift(h1_ref[...], p[:, 0:1], p[:, 1:2], n_b)
            s1_ref[...] = s
            t1_ref[...] = sh

        a1 = _leaky_relu(h1_ref[t] * s1_ref[...] + t1_ref[...])          # f32
        # b2 bias dropped: exactly cancelled by BN2's mean subtraction.
        h2_ref[t] = jnp.dot(w2_ref[...], a1.astype(jnp.bfloat16),
                            preferred_element_type=jnp.float32)
        o_ref[...] = jnp.zeros_like(o_ref)

    # ---- phase 2: global-batch BN2 + LeakyReLU + Linear(c_q, 1) -----------
    @pl.when(ph == 2)
    def _():
        @pl.when(t == 0)
        def _():
            s, sh = _bn_scale_shift(h2_ref[...], p[:c_q, 2:3], p[:c_q, 3:4], n_b)
            s2_ref[...] = s
            t2_ref[...] = sh

        a2 = _leaky_relu(h2_ref[t] * s2_ref[...] + t2_ref[...])   # (c_q, tile_b)
        w3 = p[:c_q, 4:5]
        b3 = p[0:1, 5:6]
        # Linear(c_q, 1): VPU multiply + sublane reduce -> lane-dense row.
        o_ref[...] = (jnp.sum(a2 * w3, axis=0, keepdims=True) + b3
                      ).astype(o_ref.dtype)


def pack_params(params):
    """PyTorch-layout params -> kernel representation (one small-param DMA).

    Returns {"w1": bf16 (c_m,c_in), "w2": bf16 (c_q,c_m), "pvec": f32 (c_m,8)}.
    b2 is intentionally NOT packed: training-mode BatchNorm cancels it.
    """
    c_m = params["w1"].shape[0]
    c_q = params["w2"].shape[0]
    pvec = jnp.zeros((c_m, 8), jnp.float32)
    pvec = pvec.at[:, 0].set(params["g1"])
    pvec = pvec.at[:, 1].set(params["be1"])
    pvec = pvec.at[:c_q, 2].set(params["g2"])
    pvec = pvec.at[:c_q, 3].set(params["be2"])
    pvec = pvec.at[:c_q, 4].set(params["w3"].reshape(-1))
    pvec = pvec.at[0, 5].set(params["b3"][0])
    return {"w1": params["w1"].astype(jnp.bfloat16),
            "w2": params["w2"].astype(jnp.bfloat16),
            "pvec": pvec}


def _choose_tile_b(B, target=2048):
    """Largest lane tile that divides B: a 128-multiple up to `target`, else B."""
    if B % 128 != 0:
        return B                     # small / ragged batch: single whole-batch tile
    tb = target
    while B % tb != 0:
        tb //= 2
    return max(min(tb, B), 128)


def heatmap_discriminator_t(x_t, packed, *, tile_b=None):
    """Fused discriminator forward.

    x_t: (c_in, B) bf16, pre-transposed (batch on lanes).  This is the
    preferred entry point -- produce this layout/dtype upstream.
    Returns (1, B) f32 logits (lane-dense).
    """
    c_in, B = x_t.shape
    w1, w2, pvec = packed["w1"], packed["w2"], packed["pvec"]
    c_m, c_q = w1.shape[0], w2.shape[0]

    if tile_b is None:
        tile_b = _choose_tile_b(B)
    assert B % tile_b == 0, "tile_b must divide B (global-batch BN)"
    n_tiles = B // tile_b

    def x_map(ph, t):
        # x is only consumed in phase 0; park on block 0 afterwards so
        # consecutive steps keep the same index and the re-fetch DMA is skipped.
        return (0, jnp.where(ph == 0, t, 0))

    const = lambda ph, t: (0, 0)

    grid_spec = pltpu.PrefetchScalarGridSpec(
        num_scalar_prefetch=0,
        grid=(3, n_tiles),                                   # (phase, batch tile)
        in_specs=[
            pl.BlockSpec((c_in, tile_b), x_map),
            pl.BlockSpec((c_m, c_in), const),                # resident weights
            pl.BlockSpec((c_q, c_m), const),
            pl.BlockSpec((c_m, 8), const),                   # packed small params
        ],
        out_specs=pl.BlockSpec((1, tile_b), lambda ph, t: (0, t)),
        scratch_shapes=[
            pltpu.VMEM((n_tiles, c_m, tile_b), jnp.float32),  # h1 stash
            pltpu.VMEM((n_tiles, c_q, tile_b), jnp.float32),  # h2 stash
            pltpu.VMEM((c_m, 1), jnp.float32),                # BN1 scale
            pltpu.VMEM((c_m, 1), jnp.float32),                # BN1 shift
            pltpu.VMEM((c_q, 1), jnp.float32),                # BN2 scale
            pltpu.VMEM((c_q, 1), jnp.float32),                # BN2 shift
        ],
    )

    # VMEM budget: whole-batch stash + double-buffered x/out tiles + weights.
    stash = (c_m + c_q) * B * 4
    bufs = 2 * (c_in * tile_b * 2 + tile_b * 4)
    weights = (c_m * c_in + c_q * c_m) * 2 + c_m * 8 * 4
    needed = stash + bufs + weights
    vmem_limit = int(min(96 * 2 ** 20, max(2 * needed, 32 * 2 ** 20)))

    return pl.pallas_call(
        heatmap_disc_kernel,
        out_shape=jax.ShapeDtypeStruct((1, B), jnp.float32),
        grid_spec=grid_spec,
        compiler_params=pltpu.CompilerParams(
            # Global-batch BN statistics serialize the tile axis.
            dimension_semantics=("arbitrary", "arbitrary"),
            vmem_limit_bytes=vmem_limit),
    )(x_t, w1, w2, pvec)


def heatmap_discriminator(embd, packed, *, tile_b=None):
    """PyTorch-layout convenience entry: embd (B, c_in) -> (B, 1) f32 logits.

    The transpose/cast here is a separate XLA op; for the large-B / fused
    producer path feed (c_in, B) bf16 directly to heatmap_discriminator_t.
    Batch every discriminator invocation of the step into ONE call.
    """
    x_t = embd.T.astype(jnp.bfloat16)
    out = heatmap_discriminator_t(x_t, packed, tile_b=tile_b)
    return out.reshape(embd.shape[0], 1)


# ----------------------------- references ----------------------------------

def init_params(key, c_in, c_m):
    """Deterministic synthetic parameters in native PyTorch layout."""
    c_q = c_m // 4
    ks = jax.random.split(key, 9)

    def unif(k, shape, fan_in):
        bound = 1.0 / (fan_in ** 0.5)
        return jax.random.uniform(k, shape, jnp.float32, -bound, bound)

    return {
        "w1": unif(ks[0], (c_m, c_in), c_in),     # Linear weight (out,in), bias=False
        "g1": jax.random.uniform(ks[1], (c_m,), jnp.float32, 0.5, 1.5),
        "be1": jax.random.uniform(ks[2], (c_m,), jnp.float32, -0.5, 0.5),
        "w2": unif(ks[3], (c_q, c_m), c_m),
        "b2": unif(ks[4], (c_q,), c_m),           # kept for the exact f32 reference
        "g2": jax.random.uniform(ks[5], (c_q,), jnp.float32, 0.5, 1.5),
        "be2": jax.random.uniform(ks[6], (c_q,), jnp.float32, -0.5, 0.5),
        "w3": unif(ks[7], (1, c_q), c_q),
        "b3": unif(ks[8], (1,), c_q),
    }


def reference_forward_f32(embd, p):
    """Exact PyTorch training-mode forward, pure f32 (includes b2)."""
    h = embd @ p["w1"].T
    mu = h.mean(0, keepdims=True)
    var = ((h - mu) ** 2).mean(0, keepdims=True)
    h = (h - mu) / jnp.sqrt(var + BN_EPS) * p["g1"] + p["be1"]
    h = jnp.where(h > 0, h, LEAKY_SLOPE * h)
    h = h @ p["w2"].T + p["b2"]
    mu = h.mean(0, keepdims=True)
    var = ((h - mu) ** 2).mean(0, keepdims=True)
    h = (h - mu) / jnp.sqrt(var + BN_EPS) * p["g2"] + p["be2"]
    h = jnp.where(h > 0, h, LEAKY_SLOPE * h)
    return h @ p["w3"].T + p["b3"]


def reference_forward_bf16(embd, p):
    """Reference mirroring the kernel's numerics (bf16 MXU inputs, f32 math,
    two-pass BN, b2 dropped since BN cancels it)."""
    bf = jnp.bfloat16

    def bn(h, g, b):
        mu = h.mean(0, keepdims=True)
        var = ((h - mu) ** 2).mean(0, keepdims=True)
        s = g * lax.rsqrt(var + BN_EPS)
        return h * s + (b - mu * s)

    h = jnp.dot(embd.astype(bf), p["w1"].astype(bf).T,
                preferred_element_type=jnp.float32)
    h = _leaky_relu(bn(h, p["g1"], p["be1"]))
    h = jnp.dot(h.astype(bf), p["w2"].astype(bf).T,
                preferred_element_type=jnp.float32)
    h = _leaky_relu(bn(h, p["g2"], p["be2"]))
    return jnp.sum(h * p["w3"], axis=-1, keepdims=True) + p["b3"]


if __name__ == "__main__":
    C_IN, C_M = 32, 32   # cfg.HEATMAP_DISCRIMINATOR.{INPUT_CHANNELS, INTER_CHANNELS}
    key = jax.random.PRNGKey(0)
    k_x, k_p, k_x2 = jax.random.split(key, 3)
    params = init_params(k_p, C_IN, C_M)
    packed = pack_params(params)

    # --- small shipped-size batch (single tile, 3-phase grid) --------------
    B = 8
    embd = jax.random.normal(k_x, (B, C_IN), jnp.float32)
    out = jax.block_until_ready(heatmap_discriminator(embd, packed))
    assert out.shape == (B, 1)
    ref = reference_forward_bf16(embd, params)
    assert jnp.allclose(out, ref, atol=5e-3, rtol=5e-3), "mismatch vs bf16 ref"
    ref32 = reference_forward_f32(embd, params)
    assert float(jnp.max(jnp.abs(out - ref32))) < 0.1, "drifted from f32 ref"

    # --- multi-tile path: 128-lane tiles with global-batch BN across tiles --
    B2 = 256
    embd2 = jax.random.normal(k_x2, (B2, C_IN), jnp.float32)
    out2 = jax.block_until_ready(heatmap_discriminator(embd2, packed, tile_b=128))
    assert out2.shape == (B2, 1)
    ref2 = reference_forward_bf16(embd2, params)
    assert jnp.allclose(out2, ref2, atol=5e-3, rtol=5e-3), "mismatch (tiled path)"

    print("KERNEL_OK")
</pallas_src>

<mosaic_0001>
module attributes {stable_mosaic.version = 11 : i64} {
  func.func @heatmap_disc_kernel(%arg0: i32, %arg1: i32, %arg2: memref<32x8xbf16, #tpu.memory_space<vmem>>, %arg3: memref<32x32xbf16, #tpu.memory_space<vmem>>, %arg4: memref<8x32xbf16, #tpu.memory_space<vmem>>, %arg5: memref<32x8xf32, #tpu.memory_space<vmem>>, %arg6: memref<1x8xf32, #tpu.memory_space<vmem>>, %arg7: memref<1x32x8xf32, #tpu.memory_space<vmem>>, %arg8: memref<1x8x8xf32, #tpu.memory_space<vmem>>, %arg9: memref<32x1xf32, #tpu.memory_space<vmem>>, %arg10: memref<32x1xf32, #tpu.memory_space<vmem>>, %arg11: memref<8x1xf32, #tpu.memory_space<vmem>>, %arg12: memref<8x1xf32, #tpu.memory_space<vmem>>) attributes {dimension_semantics = [#tpu.dimension_semantics<arbitrary>, #tpu.dimension_semantics<arbitrary>], iteration_bounds = array<i64: 3, 1>, scalar_prefetch = 0 : i64, scratch_operands = 6 : i64, tpu.core_type = #tpu.core_type<tc>, window_params = [{transform_indices = @transform_0, window_bounds = array<i64: 32, 8>}, {pipeline_mode = #tpu.pipeline_mode<synchronous>, transform_indices = @transform_1, window_bounds = array<i64: 32, 32>}, {pipeline_mode = #tpu.pipeline_mode<synchronous>, transform_indices = @transform_2, window_bounds = array<i64: 8, 32>}, {pipeline_mode = #tpu.pipeline_mode<synchronous>, transform_indices = @transform_3, window_bounds = array<i64: 32, 8>}, {transform_indices = @transform_4, window_bounds = array<i64: 1, 8>}]} {
    %c0 = arith.constant 0 : index
    %c0_0 = arith.constant 0 : index
    %0 = vector.load %arg5[%c0, %c0_0] : memref<32x8xf32, #tpu.memory_space<vmem>>, vector<32x8xf32>
    %c0_i32 = arith.constant 0 : i32
    %1 = arith.cmpi eq, %arg0, %c0_i32 : i32
    %2 = arith.extui %1 : i1 to i32
    %c0_i32_1 = arith.constant 0 : i32
    %3 = arith.cmpi ne, %2, %c0_i32_1 : i32
    scf.if %3 {
      %c0_4 = arith.constant 0 : index
      %c0_5 = arith.constant 0 : index
      %10 = vector.load %arg3[%c0_4, %c0_5] : memref<32x32xbf16, #tpu.memory_space<vmem>>, vector<32x32xbf16>
      %c0_6 = arith.constant 0 : index
      %c0_7 = arith.constant 0 : index
      %11 = vector.load %arg2[%c0_6, %c0_7] : memref<32x8xbf16, #tpu.memory_space<vmem>>, vector<32x8xbf16>
      %cst = arith.constant dense<0.000000e+00> : vector<32x8xf32>
      %12 = tpu.matmul %10, %11, %cst {dimension_numbers = #tpu.dot_dimension_numbers<[1], [0], [0], [1], [0, 0, 1, 1], [], []>} : vector<32x32xbf16>, vector<32x8xbf16>, vector<32x8xf32> -> vector<32x8xf32>
      %13 = arith.index_cast %arg1 : i32 to index
      %c0_8 = arith.constant 0 : index
      %c0_9 = arith.constant 0 : index
      %14 = vector.load %arg7[%13, %c0_8, %c0_9] : memref<1x32x8xf32, #tpu.memory_space<vmem>>, vector<1x32x8xf32>
      %15 = vector.shape_cast %14 : vector<1x32x8xf32> to vector<32x8xf32>
      %16 = vector.shape_cast %12 : vector<32x8xf32> to vector<1x32x8xf32>
      tpu.vector_store %arg7[%13, %c0_8, %c0_9], %16 {strides = array<i32>} : memref<1x32x8xf32, #tpu.memory_space<vmem>>, vector<1x32x8xf32>,
      %cst_10 = arith.constant 0.000000e+00 : f32
      %17 = vector.broadcast %cst_10 : f32 to vector<1x8xf32>
      %c0_11 = arith.constant 0 : index
      %c0_12 = arith.constant 0 : index
      %18 = vector.load %arg6[%c0_11, %c0_12] : memref<1x8xf32, #tpu.memory_space<vmem>>, vector<1x8xf32>
      tpu.vector_store %arg6[%c0_11, %c0_12], %17 {strides = array<i32>} : memref<1x8xf32, #tpu.memory_space<vmem>>, vector<1x8xf32>,
    } else {
    }
    %c1_i32 = arith.constant 1 : i32
    %4 = arith.cmpi eq, %arg0, %c1_i32 : i32
    %5 = arith.extui %4 : i1 to i32
    %c0_i32_2 = arith.constant 0 : i32
    %6 = arith.cmpi ne, %5, %c0_i32_2 : i32
    scf.if %6 {
      %c0_i32_4 = arith.constant 0 : i32
      %10 = arith.cmpi eq, %arg1, %c0_i32_4 : i32
      %11 = arith.extui %10 : i1 to i32
      %c0_i32_5 = arith.constant 0 : i32
      %12 = arith.cmpi ne, %11, %c0_i32_5 : i32
      scf.if %12 {
        %c0_21 = arith.constant 0 : index
        %c0_22 = arith.constant 0 : index
        %c0_23 = arith.constant 0 : index
        %36 = vector.load %arg7[%c0_21, %c0_22, %c0_23] : memref<1x32x8xf32, #tpu.memory_space<vmem>>, vector<1x32x8xf32>
        %37 = vector.extract_strided_slice %0 {offsets = [0, 0], sizes = [32, 1], strides = [1, 1]} : vector<32x8xf32> to vector<32x1xf32>
        %38 = vector.extract_strided_slice %0 {offsets = [0, 1], sizes = [32, 1], strides = [1, 1]} : vector<32x8xf32> to vector<32x1xf32>
        %cst_24 = arith.constant dense<0.000000e+00> : vector<32x8xf32>
        %39 = vector.multi_reduction <add>, %36, %cst_24 [0] : vector<1x32x8xf32> to vector<32x8xf32>
        %cst_25 = arith.constant dense<0.000000e+00> : vector<32xf32>
        %40 = vector.multi_reduction <add>, %39, %cst_25 [1] : vector<32x8xf32> to vector<32xf32>
        %41 = vector.shape_cast %40 : vector<32xf32> to vector<32x1xf32>
        %cst_26 = arith.constant 1.250000e-01 : f32
        %42 = vector.broadcast %cst_26 : f32 to vector<32x1xf32>
        %43 = arith.mulf %41, %42 : vector<32x1xf32>
        %44 = vector.shape_cast %43 : vector<32x1xf32> to vector<1x32x1xf32>
        %45 = vector.broadcast %44 : vector<1x32x1xf32> to vector<1x32x8xf32>
        %46 = arith.subf %36, %45 : vector<1x32x8xf32>
        %47 = arith.mulf %46, %46 : vector<1x32x8xf32>
        %cst_27 = arith.constant dense<0.000000e+00> : vector<32x8xf32>
        %48 = vector.multi_reduction <add>, %47, %cst_27 [0] : vector<1x32x8xf32> to vector<32x8xf32>
        %cst_28 = arith.constant dense<0.000000e+00> : vector<32xf32>
        %49 = vector.multi_reduction <add>, %48, %cst_28 [1] : vector<32x8xf32> to vector<32xf32>
        %50 = vector.shape_cast %49 : vector<32xf32> to vector<32x1xf32>
        %cst_29 = arith.constant 1.250000e-01 : f32
        %51 = vector.broadcast %cst_29 : f32 to vector<32x1xf32>
        %52 = arith.mulf %50, %51 : vector<32x1xf32>
        %cst_30 = arith.constant 9.99999974E-6 : f32
        %53 = vector.broadcast %cst_30 : f32 to vector<32x1xf32>
        %54 = arith.addf %52, %53 : vector<32x1xf32>
        %55 = math.rsqrt %54 : vector<32x1xf32>
        %56 = arith.mulf %37, %55 : vector<32x1xf32>
        %57 = arith.mulf %43, %56 : vector<32x1xf32>
        %58 = arith.subf %38, %57 : vector<32x1xf32>
        %c0_31 = arith.constant 0 : index
        %c0_32 = arith.constant 0 : index
        %59 = vector.load %arg9[%c0_31, %c0_32] : memref<32x1xf32, #tpu.memory_space<vmem>>, vector<32x1xf32>
        tpu.vector_store %arg9[%c0_31, %c0_32], %56 {strides = array<i32>} : memref<32x1xf32, #tpu.memory_space<vmem>>, vector<32x1xf32>,
        %c0_33 = arith.constant 0 : index
        %c0_34 = arith.constant 0 : index
        %60 = vector.load %arg10[%c0_33, %c0_34] : memref<32x1xf32, #tpu.memory_space<vmem>>, vector<32x1xf32>
        tpu.vector_store %arg10[%c0_33, %c0_34], %58 {strides = array<i32>} : memref<32x1xf32, #tpu.memory_space<vmem>>, vector<32x1xf32>,
      } else {
      }
      %13 = arith.index_cast %arg1 : i32 to index
      %c0_6 = arith.constant 0 : index
      %c0_7 = arith.constant 0 : index
      %14 = vector.load %arg7[%13, %c0_6, %c0_7] : memref<1x32x8xf32, #tpu.memory_space<vmem>>, vector<1x32x8xf32>
      %15 = vector.shape_cast %14 : vector<1x32x8xf32> to vector<32x8xf32>
      %c0_8 = arith.constant 0 : index
      %c0_9 = arith.constant 0 : index
      %16 = vector.load %arg9[%c0_8, %c0_9] : memref<32x1xf32, #tpu.memory_space<vmem>>, vector<32x1xf32>
      %17 = vector.broadcast %16 : vector<32x1xf32> to vector<32x8xf32>
      %18 = arith.mulf %15, %17 : vector<32x8xf32>
      %c0_10 = arith.constant 0 : index
      %c0_11 = arith.constant 0 : index
      %19 = vector.load %arg10[%c0_10, %c0_11] : memref<32x1xf32, #tpu.memory_space<vmem>>, vector<32x1xf32>
      %20 = vector.broadcast %19 : vector<32x1xf32> to vector<32x8xf32>
      %21 = arith.addf %18, %20 : vector<32x8xf32>
      %cst = arith.constant 0.000000e+00 : f32
      %22 = vector.broadcast %cst : f32 to vector<32x8xf32>
      %23 = arith.cmpf ogt, %21, %22 : vector<32x8xf32>
      %cst_12 = arith.constant 2.000000e-01 : f32
      %24 = vector.broadcast %cst_12 : f32 to vector<32x8xf32>
      %25 = arith.mulf %24, %21 : vector<32x8xf32>
      %26 = arith.select %23, %21, %25 : vector<32x8xi1>, vector<32x8xf32>
      %c0_13 = arith.constant 0 : index
      %c0_14 = arith.constant 0 : index
      %27 = vector.load %arg4[%c0_13, %c0_14] : memref<8x32xbf16, #tpu.memory_space<vmem>>, vector<8x32xbf16>
      %28 = arith.truncf %26 : vector<32x8xf32> to vector<32x8xbf16>
      %cst_15 = arith.constant dense<0.000000e+00> : vector<8x8xf32>
      %29 = tpu.matmul %27, %28, %cst_15 {dimension_numbers = #tpu.dot_dimension_numbers<[1], [0], [0], [1], [0, 0, 1, 1], [], []>} : vector<8x32xbf16>, vector<32x8xbf16>, vector<8x8xf32> -> vector<8x8xf32>
      %30 = arith.index_cast %arg1 : i32 to index
      %c0_16 = arith.constant 0 : index
      %c0_17 = arith.constant 0 : index
      %31 = vector.load %arg8[%30, %c0_16, %c0_17] : memref<1x8x8xf32, #tpu.memory_space<vmem>>, vector<1x8x8xf32>
      %32 = vector.shape_cast %31 : vector<1x8x8xf32> to vector<8x8xf32>
      %33 = vector.shape_cast %29 : vector<8x8xf32> to vector<1x8x8xf32>
      tpu.vector_store %arg8[%30, %c0_16, %c0_17], %33 {strides = array<i32>} : memref<1x8x8xf32, #tpu.memory_space<vmem>>, vector<1x8x8xf32>,
      %cst_18 = arith.constant 0.000000e+00 : f32
      %34 = vector.broadcast %cst_18 : f32 to vector<1x8xf32>
      %c0_19 = arith.constant 0 : index
      %c0_20 = arith.constant 0 : index
      %35 = vector.load %arg6[%c0_19, %c0_20] : memref<1x8xf32, #tpu.memory_space<vmem>>, vector<1x8xf32>
      tpu.vector_store %arg6[%c0_19, %c0_20], %34 {strides = array<i32>} : memref<1x8xf32, #tpu.memory_space<vmem>>, vector<1x8xf32>,
    } else {
    }
    %c2_i32 = arith.constant 2 : i32
    %7 = arith.cmpi eq, %arg0, %c2_i32 : i32
    %8 = arith.extui %7 : i1 to i32
    %c0_i32_3 = arith.constant 0 : i32
    %9 = arith.cmpi ne, %8, %c0_i32_3 : i32
    scf.if %9 {
      %c0_i32_4 = arith.constant 0 : i32
      %10 = arith.cmpi eq, %arg1, %c0_i32_4 : i32
      %11 = arith.extui %10 : i1 to i32
      %c0_i32_5 = arith.constant 0 : i32
      %12 = arith.cmpi ne, %11, %c0_i32_5 : i32
      scf.if %12 {
        %c0_16 = arith.constant 0 : index
        %c0_17 = arith.constant 0 : index
        %c0_18 = arith.constant 0 : index
        %36 = vector.load %arg8[%c0_16, %c0_17, %c0_18] : memref<1x8x8xf32, #tpu.memory_space<vmem>>, vector<1x8x8xf32>
        %37 = vector.extract_strided_slice %0 {offsets = [0, 2], sizes = [8, 1], strides = [1, 1]} : vector<32x8xf32> to vector<8x1xf32>
        %38 = vector.extract_strided_slice %0 {offsets = [0, 3], sizes = [8, 1], strides = [1, 1]} : vector<32x8xf32> to vector<8x1xf32>
        %cst_19 = arith.constant dense<0.000000e+00> : vector<8x8xf32>
        %39 = vector.multi_reduction <add>, %36, %cst_19 [0] : vector<1x8x8xf32> to vector<8x8xf32>
        %cst_20 = arith.constant dense<0.000000e+00> : vector<8xf32>
        %40 = vector.multi_reduction <add>, %39, %cst_20 [1] : vector<8x8xf32> to vector<8xf32>
        %41 = vector.shape_cast %40 : vector<8xf32> to vector<8x1xf32>
        %cst_21 = arith.constant 1.250000e-01 : f32
        %42 = vector.broadcast %cst_21 : f32 to vector<8x1xf32>
        %43 = arith.mulf %41, %42 : vector<8x1xf32>
        %44 = vector.shape_cast %43 : vector<8x1xf32> to vector<1x8x1xf32>
        %45 = vector.broadcast %44 : vector<1x8x1xf32> to vector<1x8x8xf32>
        %46 = arith.subf %36, %45 : vector<1x8x8xf32>
        %47 = arith.mulf %46, %46 : vector<1x8x8xf32>
        %cst_22 = arith.constant dense<0.000000e+00> : vector<8x8xf32>
        %48 = vector.multi_reduction <add>, %47, %cst_22 [0] : vector<1x8x8xf32> to vector<8x8xf32>
        %cst_23 = arith.constant dense<0.000000e+00> : vector<8xf32>
        %49 = vector.multi_reduction <add>, %48, %cst_23 [1] : vector<8x8xf32> to vector<8xf32>
        %50 = vector.shape_cast %49 : vector<8xf32> to vector<8x1xf32>
        %cst_24 = arith.constant 1.250000e-01 : f32
        %51 = vector.broadcast %cst_24 : f32 to vector<8x1xf32>
        %52 = arith.mulf %50, %51 : vector<8x1xf32>
        %cst_25 = arith.constant 9.99999974E-6 : f32
        %53 = vector.broadcast %cst_25 : f32 to vector<8x1xf32>
        %54 = arith.addf %52, %53 : vector<8x1xf32>
        %55 = math.rsqrt %54 : vector<8x1xf32>
        %56 = arith.mulf %37, %55 : vector<8x1xf32>
        %57 = arith.mulf %43, %56 : vector<8x1xf32>
        %58 = arith.subf %38, %57 : vector<8x1xf32>
        %c0_26 = arith.constant 0 : index
        %c0_27 = arith.constant 0 : index
        %59 = vector.load %arg11[%c0_26, %c0_27] : memref<8x1xf32, #tpu.memory_space<vmem>>, vector<8x1xf32>
        tpu.vector_store %arg11[%c0_26, %c0_27], %56 {strides = array<i32>} : memref<8x1xf32, #tpu.memory_space<vmem>>, vector<8x1xf32>,
        %c0_28 = arith.constant 0 : index
        %c0_29 = arith.constant 0 : index
        %60 = vector.load %arg12[%c0_28, %c0_29] : memref<8x1xf32, #tpu.memory_space<vmem>>, vector<8x1xf32>
        tpu.vector_store %arg12[%c0_28, %c0_29], %58 {strides = array<i32>} : memref<8x1xf32, #tpu.memory_space<vmem>>, vector<8x1xf32>,
      } else {
      }
      %13 = arith.index_cast %arg1 : i32 to index
      %c0_6 = arith.constant 0 : index
      %c0_7 = arith.constant 0 : index
      %14 = vector.load %arg8[%13, %c0_6, %c0_7] : memref<1x8x8xf32, #tpu.memory_space<vmem>>, vector<1x8x8xf32>
      %15 = vector.shape_cast %14 : vector<1x8x8xf32> to vector<8x8xf32>
      %c0_8 = arith.constant 0 : index
      %c0_9 = arith.constant 0 : index
      %16 = vector.load %arg11[%c0_8, %c0_9] : memref<8x1xf32, #tpu.memory_space<vmem>>, vector<8x1xf32>
      %17 = vector.broadcast %16 : vector<8x1xf32> to vector<8x8xf32>
      %18 = arith.mulf %15, %17 : vector<8x8xf32>
      %c0_10 = arith.constant 0 : index
      %c0_11 = arith.constant 0 : index
      %19 = vector.load %arg12[%c0_10, %c0_11] : memref<8x1xf32, #tpu.memory_space<vmem>>, vector<8x1xf32>
      %20 = vector.broadcast %19 : vector<8x1xf32> to vector<8x8xf32>
      %21 = arith.addf %18, %20 : vector<8x8xf32>
      %cst = arith.constant 0.000000e+00 : f32
      %22 = vector.broadcast %cst : f32 to vector<8x8xf32>
      %23 = arith.cmpf ogt, %21, %22 : vector<8x8xf32>
      %cst_12 = arith.constant 2.000000e-01 : f32
      %24 = vector.broadcast %cst_12 : f32 to vector<8x8xf32>
      %25 = arith.mulf %24, %21 : vector<8x8xf32>
      %26 = arith.select %23, %21, %25 : vector<8x8xi1>, vector<8x8xf32>
      %27 = vector.extract_strided_slice %0 {offsets = [0, 4], sizes = [8, 1], strides = [1, 1]} : vector<32x8xf32> to vector<8x1xf32>
      %28 = vector.extract_strided_slice %0 {offsets = [0, 5], sizes = [1, 1], strides = [1, 1]} : vector<32x8xf32> to vector<1x1xf32>
      %29 = vector.broadcast %27 : vector<8x1xf32> to vector<8x8xf32>
      %30 = arith.mulf %26, %29 : vector<8x8xf32>
      %cst_13 = arith.constant dense<0.000000e+00> : vector<8xf32>
      %31 = vector.multi_reduction <add>, %30, %cst_13 [0] : vector<8x8xf32> to vector<8xf32>
      %32 = vector.shape_cast %31 : vector<8xf32> to vector<1x8xf32>
      %33 = vector.broadcast %28 : vector<1x1xf32> to vector<1x8xf32>
      %34 = arith.addf %32, %33 : vector<1x8xf32>
      %c0_14 = arith.constant 0 : index
      %c0_15 = arith.constant 0 : index
      %35 = vector.load %arg6[%c0_14, %c0_15] : memref<1x8xf32, #tpu.memory_space<vmem>>, vector<1x8xf32>
      tpu.vector_store %arg6[%c0_14, %c0_15], %34 {strides = array<i32>} : memref<1x8xf32, #tpu.memory_space<vmem>>, vector<1x8xf32>,
    } else {
    }
    return
  }
  func.func @transform_0(%arg0: i32, %arg1: i32) -> (i32, i32) {
    %c0_i32 = arith.constant 0 : i32
    %0 = arith.cmpi eq, %arg0, %c0_i32 : i32
    %c0_i32_0 = arith.constant 0 : i32
    %1 = arith.select %0, %arg1, %c0_i32_0 : i32
    %c0_i32_1 = arith.constant 0 : i32
    %c0_i32_2 = arith.constant 0 : i32
    return %c0_i32_1, %1 : i32, i32
  }
  func.func @transform_1(%arg0: i32, %arg1: i32) -> (i32, i32) {
    %c0_i32 = arith.constant 0 : i32
    %c0_i32_0 = arith.constant 0 : i32
    %c0_i32_1 = arith.constant 0 : i32
    return %c0_i32, %c0_i32_0 : i32, i32
  }
  func.func @transform_2(%arg0: i32, %arg1: i32) -> (i32, i32) {
    %c0_i32 = arith.constant 0 : i32
    %c0_i32_0 = arith.constant 0 : i32
    %c0_i32_1 = arith.constant 0 : i32
    return %c0_i32, %c0_i32_0 : i32, i32
  }
  func.func @transform_3(%arg0: i32, %arg1: i32) -> (i32, i32) {
    %c0_i32 = arith.constant 0 : i32
    %c0_i32_0 = arith.constant 0 : i32
    %c0_i32_1 = arith.constant 0 : i32
    return %c0_i32, %c0_i32_0 : i32, i32
  }
  func.func @transform_4(%arg0: i32, %arg1: i32) -> (i32, i32) {
    %c0_i32 = arith.constant 0 : i32
    %c0_i32_0 = arith.constant 0 : i32
    return %c0_i32, %arg1 : i32, i32
  }
}

</mosaic_0001>

<bundles_post_ra>
// kernel: tpu_custom_call.1
= control target key start
LH: loop header
LB: loop body
LE: loop exit
PB: predicated region body
PF: predicated region fallthrough
CT: control target
= control target key end

     0   :  { %9 = vsyncpa [#allocation9], 0  ;;  %s893_s15 = smov 0   ;;  %s895_s16 = smov 0   ;;  %s1034_s0 = inlined_call_operand.vmem [shape: bf16[32,8], index: 0, kind: input, shape index: {}]   ;;  %s1035_s1 = inlined_call_operand.vmem [shape: bf16[32,32], index: 1, kind: input, shape index: {}]   ;;  %s1036_s2 = inlined_call_operand.vmem [shape: bf16[8,32], index: 2, kind: input, shape index: {}]   ;;  %s1037_s3 = inlined_call_operand.vmem [shape: f32[32,8], index: 3, kind: input, shape index: {}]   ;;  %s1038_s4 = inlined_call_operand.hbm [shape: f32[1,8], index: 4, kind: output, shape index: {}]  }
   0x1   :  { %s897_s17 = smov 0  }
   0x2 LB: > { %s703_s18 = sadd.s32 4294967295, %s854_s17   ;;  %s27_s19 = sadd.s32 1, %s850_s16  ;;  %s854_s17 = sphi %s897_s17, %s15_s17   ;;  %s850_s16 = sphi %s895_s16, %s1040_s16   ;;  %s846_s15 = sphi %s893_s15, %s1039_s15  }
   0x3   : > { %p29_p0 = scmp.ge.s32.totalorder %s27_s19, 3  ;;  %p707_p1 = scmp.ge.s32.totalorder %s854_s17, 1 }
   0x4   : > { %p182_p2 = scmp.lt.s32.totalorder %s854_s17, 4 }
   0x5   : > { %s1042_s19 = smov (%p29_p0, %s27_s19), 0 }
   0x6   : > { %p183_p3 = pnand %p707_p1, %p182_p2 }
   0x7   : > { %p708_p4 = scmp.ne.s32.totalorder (!%p183_p3), %s846_s15, 0 }
   0x8   : > { %186 = sbr.rel (%p183_p3) target bundleno = 1570 (0x622), region = 36 }
   0xd   : > { %v917_v0 = vld [vmem:[%s1037_s3] sm:$0xff]  ;;  %v922_v1 = vld [vmem:[%s1037_s3 + $0x8] sm:$0xff]  ;;  %v927_v2 = vld [vmem:[%s1037_s3 + $0x10] sm:$0xff]  ;;  %220 = sbr.rel (%p708_p4) target bundleno = 162 (0xa2), region = 40 }
   0xe   : > { %v932_v3 = vld [vmem:[%s1037_s3 + $0x18] sm:$0xff] }
  0x12   : > { %v737_v4 = vld [vmem:[%s1034_s0 + $0x8] sm:$0xff]  ;;  %v736_v5 = vld [vmem:[%s1034_s0] sm:$0xff]  ;;  %vm251_vm0 = vcmask 261120   ;;  %vm284_vm1 = vcmask 57344   ;;  %v856_v8 = vmov 0.0   ;;  %vm279_vm2 = vcmask 64512  }
  0x13   : > { %264 = vmatpush.bf16.msra.mxu0 %v737_v4  ;;  %738 = vmatpush.bf16.msra.mxu1 %v737_v4  ;;  %v734_v6 = vld [vmem:[%s1035_s1] sm:$0xff]  ;;  %v735_v7 = vld [vmem:[%s1035_s1 + $0x8] sm:$0xff]  ;;  %285 = vst.msk [vmem:[#allocation8] sm:$0x1] %vm284_vm1, %v856_v8 }
  0x17   : > { %265 = vmatpush.bf16.msra.mxu0 %v736_v5  ;;  %739 = vmatpush.bf16.msra.mxu1 %v736_v5 }
  0x1a   : > { %725 = vmatmul.msk.bf16.vlgmr.msra.gmra.mxu0 %vm251_vm0, %v734_v6  ;;  %726 = vmatmul.msk.bf16.vlgmr.msra.gmra.mxu1 %vm251_vm0, %v735_v7 }
  0x97   : > { %v267_v9 = vpop.f32.mrf.mxu0  ;;  %v272_v10 = vpop.f32.mrf.mxu1 }
  0x98   : > { %280 = vst.msk [vmem:[#allocation2] sm:$0xff] %vm279_vm2, %v267_v9 }
  0x99   : > { %282 = vst.msk [vmem:[#allocation2 + $0x10] sm:$0xff] %vm279_vm2, %v272_v10 }
  0x9f   : > { %v269_v11 = vpop.f32.mrf.mxu0  ;;  %v274_v12 = vpop.f32.mrf.mxu1 }
  0xa0   : > { %281 = vst.msk [vmem:[#allocation2 + $0x8] sm:$0xff] %vm279_vm2, %v269_v11 }
  0xa1   : > { %283 = vst.msk [vmem:[#allocation2 + $0x18] sm:$0xff] %vm279_vm2, %v274_v12 }
  0xa2 PF: > { %p727_p5 = scmp.ne.s32.totalorder %s846_s15, 1 }
  0xa3   : > { %s857_s10 = smov (!%p727_p5), 1   ;;  %s859_s11 = smov (!%p727_p5), 127  }
  0xa4   : > { %289 = sbr.rel (%p727_p5) target bundleno = 936 (0x3a8), region = 44 }
  0xa9   : > { %v948_v13 = vld [vmem:[#allocation2 + $0x10] sm:$0xff]  ;;  %vm302_vm3 = vcmask 64512   ;;  %v950_v14 = vld [vmem:[#allocation2] sm:$0xff]  ;;  %v956_v17 = vld [vmem:[#allocation2 + $0x18] sm:$0xff]  ;;  %vm419_vm10 = vcmask 7168  }
  0xaa   : > { %v309_v15 = vsel %vm302_vm3, %v948_v13, 0.0  ;;  %v303_v16 = vsel %vm302_vm3, %v950_v14, 0.0  ;;  %v958_v18 = vld [vmem:[#allocation2 + $0x8] sm:$0xff]  ;;  %v312_v19 = vsel %vm302_vm3, %v956_v17, 0.0 }
  0xab   : > { %310 = vadd.xlane.f32.xlu0 %v309_v15  ;;  %304 = vadd.xlane.f32.xlu1 %v303_v16  ;;  %v306_v20 = vsel %vm302_vm3, %v958_v18, 0.0 }
  0xb3   : > { %313 = vadd.xlane.f32.xlu0 %v312_v19  ;;  %307 = vadd.xlane.f32.xlu1 %v306_v20 }
 0x11e   : > { %v311_v21 = vpop.xlane.xlu0 %310  ;;  %v305_v22 = vpop.xlane.xlu1 %304 }
 0x11f   : > { %v964_v23 = vmul.f32 0.125, %v311_v21  ;;  %v966_v24 = vmul.f32 0.125, %v305_v22 }
 0x121   : > { %v319_v25 = vsub.f32 %v950_v14, %v966_v24  ;;  %v321_v26 = vsub.f32 %v948_v13, %v964_v23 }
 0x123   : > { %v325_v27 = vmul.f32 %v321_v26, %v321_v26  ;;  %v323_v28 = vmul.f32 %v319_v25, %v319_v25 }
 0x125   : > { %v337_v29 = vsel %vm302_vm3, %v325_v27, 0.0  ;;  %v331_v30 = vsel %vm302_vm3, %v323_v28, 0.0 }
 0x126   : > { %338 = vadd.xlane.f32.xlu2 %v337_v29  ;;  %v314_v31 = vpop.xlane.xlu0 %313  ;;  %332 = vadd.xlane.f32.xlu0 %v331_v30  ;;  %v308_v32 = vpop.xlane.xlu1 %307 }
 0x127   : > { %v974_v33 = vmul.f32 0.125, %v314_v31  ;;  %v976_v34 = vmul.f32 0.125, %v308_v32 }
 0x129   : > { %v322_v35 = vsub.f32 %v956_v17, %v974_v33  ;;  %v320_v36 = vsub.f32 %v958_v18, %v976_v34 }
 0x12b   : > { %v326_v37 = vmul.f32 %v322_v35, %v322_v35  ;;  %v324_v38 = vmul.f32 %v320_v36, %v320_v36 }
 0x12d   : > { %v340_v39 = vsel %vm302_vm3, %v326_v37, 0.0  ;;  %v334_v40 = vsel %vm302_vm3, %v324_v38, 0.0  ;;  %v858_v37 = vmov 0  }
 0x12e   : > { %341 = vadd.xlane.f32.xlu2 %v340_v39  ;;  %335 = vadd.xlane.f32.xlu1 %v334_v40 }
 0x12f   : > { %783 = vset.pattern.permute.xlu1 %v858_v37  ;;  %782 = vset.pattern.permute.xlu2 %v858_v37 }
 0x130   : > { %784 = vset.pattern.permute.xlu0 %v858_v37 }
 0x199   : > { %v339_v41 = vpop.xlane.xlu2 %338  ;;  %v333_v42 = vpop.xlane.xlu0 %332 }
 0x19a   : > { %v345_v43 = vmul.f32 0.125, %v339_v41  ;;  %v343_v44 = vmul.f32 0.125, %v333_v42 }
 0x19c   : > { %v349_v45 = vadd.f32 1e-05, %v345_v43  ;;  %v347_v46 = vadd.f32 1e-05, %v343_v44 }
 0x19e   : > { %785 = vrsqrt.f32 %v349_v45  ;;  %vm377_vm4 = vweird.f32 %v349_v45  ;;  %vm357_vm8 = vweird.f32 %v347_v46 }
 0x19f   : > { %787 = vrsqrt.f32 %v347_v46 }
 0x1a1   : > { %v342_v47 = vpop.xlane.xlu2 %341  ;;  %v336_v48 = vpop.xlane.xlu1 %335 }
 0x1a2   : > { %v346_v49 = vmul.f32 0.125, %v342_v47  ;;  %v344_v50 = vmul.f32 0.125, %v336_v48 }
 0x1a4   : > { %v786_v51 = vpop.eup %785  ;;  %v350_v52 = vadd.f32 1e-05, %v346_v49  ;;  %v348_v53 = vadd.f32 1e-05, %v344_v50 }
 0x1a5   : > { %v788_v54 = vpop.eup %787  ;;  %v372_v55 = vmul.f32 %v786_v51, %v349_v45  ;;  %vm378_vm5 = vweird.f32 %v786_v51 }
 0x1a6   : > { %v352_v56 = vmul.f32 %v788_v54, %v347_v46  ;;  %789 = vrsqrt.f32 %v350_v52  ;;  %vm379_vm6 = vmor %vm377_vm4, %vm378_vm5  ;;  %vm358_vm7 = vweird.f32 %v788_v54  ;;  %vm387_vm11 = vweird.f32 %v350_v52 }
 0x1a7   : > { %v373_v57 = vmul.f32 %v786_v51, %v372_v55  ;;  %791 = vrsqrt.f32 %v348_v53  ;;  %vm359_vm9 = vmor %vm357_vm8, %vm358_vm7  ;;  %vm367_vm13 = vweird.f32 %v348_v53  ;;  %vm542_vm7 = vcmask 57344  }
 0x1a8   : > { %v353_v58 = vmul.f32 %v788_v54, %v352_v56 }
 0x1a9   : > { %v374_v59 = vmul.f32 0.5, %v373_v57 }
 0x1aa   : > { %v354_v60 = vmul.f32 0.5, %v353_v58 }
 0x1ab   : > { %v375_v61 = vsub.f32 1.5, %v374_v59 }
 0x1ac   : > { %v790_v62 = vpop.eup %789  ;;  %v355_v63 = vsub.f32 1.5, %v354_v60 }
 0x1ad   : > { %v792_v4 = vpop.eup %791  ;;  %v376_v5 = vmul.f32 %v786_v51, %v375_v61  ;;  %v382_v6 = vmul.f32 %v790_v62, %v350_v52  ;;  %vm388_vm12 = vweird.f32 %v790_v62 }
 0x1ae   : > { %v356_v7 = vmul.f32 %v788_v54, %v355_v63  ;;  %v362_v8 = vmul.f32 %v792_v4, %v348_v53  ;;  %vm368_vm14 = vweird.f32 %v792_v4  ;;  %vm389_vm15 = vmor %vm387_vm11, %vm388_vm12 }
 0x1af   : > { %v383_v9 = vmul.f32 %v790_v62, %v382_v6  ;;  %v380_v10 = vsel %vm379_vm6, %v786_v51, %v376_v5  ;;  %vm369_vm0 = vmor %vm367_vm13, %vm368_vm14  ;;  %vm521_vm6 = vcmask 261120  }
 0x1b0   : > { %v363_v11 = vmul.f32 %v792_v4, %v362_v8  ;;  %v393_v12 = vmul.f32 %v380_v10, %v927_v2  ;;  %v360_v15 = vsel %vm359_vm9, %v788_v54, %v356_v7 }
 0x1b1   : > { %v384_v16 = vmul.f32 0.5, %v383_v9  ;;  %v391_v19 = vmul.f32 %v360_v15, %v917_v0 }
 0x1b2   : > { %v364_v20 = vmul.f32 0.5, %v363_v11  ;;  %v397_v21 = vmul.f32 %v393_v12, %v964_v23  ;;  %422 = vst.msk [vmem:[#allocation4 + $0x10] sm:$0xff] %vm419_vm10, %v393_v12 }
 0x1b3   : > { %v385_v22 = vsub.f32 1.5, %v384_v16  ;;  %v395_v25 = vmul.f32 %v391_v19, %v966_v24  ;;  %420 = vst.msk [vmem:[#allocation4] sm:$0xff] %vm419_vm10, %v391_v19  ;;  %v518_v19 = vld [vmem:[%s1036_s2] sm:$0xf] }
 0x1b4   : > { %v365_v26 = vsub.f32 1.5, %v364_v20  ;;  %407 = vrot.lane.b32.xlu2 %v397_v21, %s857_s10 }
 0x1b5   : > { %v386_v27 = vmul.f32 %v790_v62, %v385_v22  ;;  %403 = vrot.lane.b32.xlu1 %v395_v25, %s857_s10 }
 0x1b6   : > { %v366_v28 = vmul.f32 %v792_v4, %v365_v26 }
 0x1b7   : > { %v390_v29 = vsel %vm389_vm15, %v790_v62, %v386_v27 }
 0x1b8   : > { %v394_v30 = vmul.f32 %v390_v29, %v932_v3  ;;  %v370_v31 = vsel %vm369_vm0, %v792_v4, %v366_v28 }
 0x1b9   : > { %v392_v23 = vmul.f32 %v370_v31, %v922_v1 }
 0x1ba   : > { %v398_v32 = vmul.f32 %v394_v30, %v974_v33  ;;  %423 = vst.msk [vmem:[#allocation4 + $0x18] sm:$0xff] %vm419_vm10, %v394_v30  ;;  %v450_v43 = vld [vmem:[#allocation4] sm:$0xff] }
 0x1bb   : > { %v396_v24 = vmul.f32 %v392_v23, %v976_v34  ;;  %421 = vst.msk [vmem:[#allocation4 + $0x8] sm:$0xff] %vm419_vm10, %v392_v23 }
 0x1bc   : > { %409 = vrot.lane.b32.xlu0 %v398_v32, %s857_s10 }
 0x1bd   : > { %405 = vrot.lane.b32.xlu2 %v396_v24, %s857_s10 }
 0x1c1   : > { %v453_v42 = vld [vmem:[#allocation4 + $0x18] sm:$0xff] }
 0x1c2   : > { %v451_v48 = vld [vmem:[#allocation4 + $0x8] sm:$0xff] }
 0x20e   : > { %v408_v35 = vpop.permute.xlu2 %407 }
 0x20f   : > { %v417_v36 = vsub.f32 %v927_v2, %v408_v35  ;;  %v452_v2 = vld [vmem:[#allocation4 + $0x10] sm:$0xff] }
 0x211   : > { %432 = vrot.lane.b32.xlu0 %v417_v36, %s859_s11 }
 0x217   : > { %v406_v38 = vpop.permute.xlu2 %405 }
 0x218   : > { %v416_v33 = vsub.f32 %v922_v1, %v406_v38 }
 0x21a   : > { %430 = vrot.lane.b32.xlu0 %v416_v33, %s859_s11 }
 0x227   : > { %v404_v39 = vpop.permute.xlu1 %403 }
 0x228   : > { %v415_v34 = vsub.f32 %v917_v0, %v404_v39 }
 0x22a   : > { %428 = vrot.lane.b32.xlu1 %v415_v34, %s859_s11 }
 0x22e   : > { %v410_v40 = vpop.permute.xlu0 %409 }
 0x22f   : > { %v418_v41 = vsub.f32 %v932_v3, %v410_v40 }
 0x231   : > { %434 = vrot.lane.b32.xlu2 %v418_v41, %s859_s11 }
 0x232   : > { %471 = vperm.xlu1 %783, %v453_v42  }
 0x239   : > { %466 = vperm.xlu2 %782, %v452_v2  }
 0x23a   : > { %456 = vperm.xlu1 %783, %v450_v43  }
 0x283   : > { %v433_v44 = vpop.permute.xlu0 %432 }
 0x284   : > { %442 = vst.msk [vmem:[#allocation5 + $0x10] sm:$0xff] %vm419_vm10, %v433_v44 }
 0x28b   : > { %v435_v45 = vpop.permute.xlu2 %434  ;;  %v480_v1 = vld [vmem:[#allocation5 + $0x10] sm:$0xff] }
 0x28c   : > { %v431_v46 = vpop.permute.xlu0 %430  ;;  %443 = vst.msk [vmem:[#allocation5 + $0x18] sm:$0xff] %vm419_vm10, %v435_v45  ;;  %494 = vperm.xlu0 %784, %v480_v1  }
 0x28d   : > { %441 = vst.msk [vmem:[#allocation5 + $0x8] sm:$0xff] %vm419_vm10, %v431_v46 }
 0x293   : > { %v481_v47 = vld [vmem:[#allocation5 + $0x18] sm:$0xff]  ;;  %v467_v51 = vpop.permute.xlu2 %466 }
 0x294   : > { %v479_v3 = vld [vmem:[#allocation5 + $0x8] sm:$0xff]  ;;  %499 = vperm.xlu2 %782, %v481_v47   ;;  %v476_v56 = vmul.f32 %v467_v51, %v948_v13 }
 0x295   : > { %489 = vperm.xlu0 %784, %v479_v3  }
 0x29c   : > { %v429_v49 = vpop.permute.xlu1 %428  ;;  %461 = vperm.xlu2 %782, %v451_v48  }
 0x29d   : > { %440 = vst.msk [vmem:[#allocation5] sm:$0xff] %vm419_vm10, %v429_v49 }
 0x2a4   : > { %v478_v50 = vld [vmem:[#allocation5] sm:$0xff]  ;;  %v472_v52 = vpop.permute.xlu1 %471 }
 0x2a5   : > { %484 = vperm.xlu1 %783, %v478_v50   ;;  %v477_v54 = vmul.f32 %v472_v52, %v956_v17 }
 0x2ac   : > { %v457_v4 = vpop.permute.xlu1 %456 }
 0x2ad   : > { %v474_v17 = vmul.f32 %v457_v4, %v950_v14 }
 0x2ee   : > { %v500_v53 = vpop.permute.xlu2 %499 }
 0x2ef   : > { %v505_v55 = vadd.f32 %v500_v53, %v477_v54 }
 0x2f1   : > { %v513_v58 = vmul.f32 0.2, %v505_v55  ;;  %vm509_vm1 = vcmp.gt.f32.partialorder %v505_v55, 0.0 }
 0x2f3   : > { %v517_v62 = vsel %vm509_vm1, %v505_v55, %v513_v58 }
 0x2f6   : > { %v462_v5 = vpop.permute.xlu2 %461 }
 0x2f7   : > { %v475_v7 = vmul.f32 %v462_v5, %v958_v18  ;;  %v860_v18 = vmov 0.0  }
 0x2f8   : > { %543 = vst.msk [vmem:[#allocation8] sm:$0x1] %vm542_vm7, %v860_v18 }
 0x2fe   : > { %v495_v57 = vpop.permute.xlu0 %494 }
 0x2ff   : > { %v504_v59 = vadd.f32 %v495_v57, %v476_v56 }
 0x301   : > { %v512_v60 = vmul.f32 0.2, %v504_v59  ;;  %vm508_vm2 = vcmp.gt.f32.partialorder %v504_v59, 0.0 }
 0x303   : > { %v516_v61 = vsel %vm508_vm2, %v504_v59, %v512_v60 }
 0x304   : > { %v520_v63 = vpack.c.bf16 %v517_v62, %v516_v61 }
 0x306   : > { %531 = vmatpush.bf16.msra.mxu0 %v520_v63 }
 0x307   : > { %v490_v6 = vpop.permute.xlu0 %489 }
 0x308   : > { %v503_v8 = vadd.f32 %v490_v6, %v475_v7 }
 0x30a   : > { %v511_v13 = vmul.f32 0.2, %v503_v8  ;;  %vm507_vm4 = vcmp.gt.f32.partialorder %v503_v8, 0.0 }
 0x30c   : > { %v515_v15 = vsel %vm507_vm4, %v503_v8, %v511_v13 }
 0x317   : > { %v485_v9 = vpop.permute.xlu1 %484 }
 0x318   : > { %v502_v10 = vadd.f32 %v485_v9, %v474_v17 }
 0x31a   : > { %v510_v11 = vmul.f32 0.2, %v502_v10  ;;  %vm506_vm5 = vcmp.gt.f32.partialorder %v502_v10, 0.0 }
 0x31c   : > { %v514_v12 = vsel %vm506_vm5, %v502_v10, %v510_v11 }
 0x31d   : > { %v519_v16 = vpack.c.bf16 %v515_v15, %v514_v12 }
 0x31f   : > { %532 = vmatpush.bf16.msra.mxu0 %v519_v16 }
 0x322   : > { %728 = vmatmul.msk.bf16.vlgmr.msra.gmra.mxu0 %vm521_vm6, %v518_v19 }
 0x39f   : > { %v534_v14 = vpop.f32.mrf.mxu0 }
 0x3a0   : > { %541 = vst.msk [vmem:[#allocation3] sm:$0xff] %vm302_vm3, %v534_v14 }
 0x3a7   : > { %v536_v20 = vpop.f32.mrf.mxu0 }
 0x3a8 PF: > { %p729_p6 = scmp.ne.s32.totalorder %s846_s15, 2 }
 0x3a9   : > { %s861_s14 = smov (!%p729_p6), 1   ;;  %s862_s15 = smov (!%p729_p6), 126  }
 0x3aa   : > { %547 = sbr.rel (%p729_p6) target bundleno = 1564 (0x61c), region = 52  ;;  %s864_s20 = smov (!%p729_p6), 125  }
 0x3af   : > { %v552_v21 = vld [vmem:[#allocation3] sm:$0xff]  ;;  %vm554_vm8 = vcmask 64512   ;;  %v863_v40 = vmov 0   ;;  %vm588_vm11 = vcmask 7168   ;;  %v865_v44 = vmov 4  }
 0x3b0   : > { %v555_v22 = vsel %vm554_vm8, %v552_v21, 0.0  ;;  %793 = vset.pattern.permute.xlu2 %v863_v40  ;;  %794 = vset.pattern.permute.xlu0 %v863_v40  ;;  %v866_v45 = vmov 5   ;;  %vm634_vm13 = vcmask 57344  }
 0x3b1   : > { %556 = vadd.xlane.f32.xlu0 %v555_v22  ;;  %795 = vset.pattern.permute.xlu1 %v865_v44 }
 0x424   : > { %v557_v25 = vpop.xlane.xlu0 %556 }
 0x425   : > { %v558_v26 = vmul.f32 0.125, %v557_v25 }
 0x427   : > { %v559_v27 = vsub.f32 %v552_v21, %v558_v26 }
 0x429   : > { %v560_v28 = vmul.f32 %v559_v27, %v559_v27 }
 0x42b   : > { %v562_v29 = vsel %vm554_vm8, %v560_v28, 0.0 }
 0x42c   : > { %563 = vadd.xlane.f32.xlu0 %v562_v29 }
 0x49f   : > { %v564_v30 = vpop.xlane.xlu0 %563 }
 0x4a0   : > { %v565_v31 = vmul.f32 0.125, %v564_v30 }
 0x4a2   : > { %v566_v23 = vadd.f32 1e-05, %v565_v31 }
 0x4a4   : > { %798 = vrsqrt.f32 %v566_v23  ;;  %vm573_vm9 = vweird.f32 %v566_v23 }
 0x4aa   : > { %v799_v32 = vpop.eup %798 }
 0x4ab   : > { %v568_v24 = vmul.f32 %v799_v32, %v566_v23  ;;  %vm574_vm3 = vweird.f32 %v799_v32 }
 0x4ac   : > { %vm575_vm10 = vmor %vm573_vm9, %vm574_vm3 }
 0x4ad   : > { %v569_v35 = vmul.f32 %v799_v32, %v568_v24 }
 0x4af   : > { %v570_v36 = vmul.f32 0.5, %v569_v35 }
 0x4b1   : > { %v571_v37 = vsub.f32 1.5, %v570_v36 }
 0x4b3   : > { %v572_v38 = vmul.f32 %v799_v32, %v571_v37 }
 0x4b5   : > { %v576_v33 = vsel %vm575_vm10, %v799_v32, %v572_v38 }
 0x4b6   : > { %v577_v39 = vmul.f32 %v576_v33, %v917_v0 }
 0x4b8   : > { %v578_v34 = vmul.f32 %v577_v39, %v558_v26 }
 0x4ba   : > { %580 = vrot.lane.b32.xlu1 %v578_v34, %s861_s14 }
 0x4c2   : > { %585 = vrot.lane.b32.xlu1 %v577_v39, %s862_s15 }
 0x4ca   : > { %617 = vperm.xlu1 %795, %v917_v0  }
 0x52c   : > { %v581_v41 = vpop.permute.xlu1 %580 }
 0x52d   : > { %v583_v42 = vsub.f32 %v917_v0, %v581_v41 }
 0x52f   : > { %591 = vrot.lane.b32.xlu2 %v583_v42, %s864_s20 }
 0x534   : > { %v586_v2 = vpop.permute.xlu1 %585 }
 0x535   : > { %589 = vst.msk [vmem:[#allocation6] sm:$0xff] %vm588_vm11, %v586_v2 }
 0x53c   : > { %v598_v43 = vld [vmem:[#allocation6] sm:$0xff]  ;;  %v618_v51 = vpop.permute.xlu1 %617 }
 0x53d   : > { %601 = vperm.xlu2 %793, %v598_v43  }
 0x545   : > { %796 = vset.pattern.permute.xlu2 %v866_v45 }
 0x546   : > { %630 = vperm.xlu2 %796, %v917_v0  }
 0x589   : > { %v592_v1 = vpop.permute.xlu2 %591 }
 0x58a   : > { %594 = vst.msk [vmem:[#allocation7] sm:$0xff] %vm588_vm11, %v592_v1 }
 0x591   : > { %v605_v46 = vld [vmem:[#allocation7] sm:$0xff] }
 0x592   : > { %608 = vperm.xlu0 %794, %v605_v46  }
 0x597   : > { %v602_v47 = vpop.permute.xlu2 %601 }
 0x598   : > { %v604_v3 = vmul.f32 %v602_v47, %v552_v21 }
 0x59a   : > { %797 = vset.pattern.permute.xlu0 %v866_v45 }
 0x5a0   : > { %v631_v59 = vpop.permute.xlu2 %630 }
 0x604   : > { %v609_v48 = vpop.permute.xlu0 %608 }
 0x605   : > { %v611_v49 = vadd.f32 %v609_v48, %v604_v3 }
 0x607   : > { %v613_v50 = vmul.f32 0.2, %v611_v49  ;;  %vm612_vm12 = vcmp.gt.f32.partialorder %v611_v49, 0.0 }
 0x609   : > { %v614_v52 = vsel %vm612_vm12, %v611_v49, %v613_v50 }
 0x60a   : > { %v620_v53 = vmul.f32 %v618_v51, %v614_v52 }
 0x60c   : > { %v622_v54 = vsel %vm554_vm8, %v620_v53, 0.0 }
 0x60d   : > { %v623_v55 = vrot.slane %v622_v54, 4 }
 0x60f   : > { %v624_v56 = vadd.f32 %v623_v55, %v622_v54 }
 0x611   : > { %v625_v57 = vrot.slane %v624_v56, 2 }
 0x613   : > { %v626_v0 = vadd.f32 %v625_v57, %v624_v56 }
 0x615   : > { %v627_v58 = vrot.slane %v626_v0, 1 }
 0x617   : > { %v628_v60 = vadd.f32 %v627_v58, %v626_v0 }
 0x619   : > { %v633_v61 = vadd.f32 %v631_v59, %v628_v60 }
 0x61b   : > { %635 = vst.msk [vmem:[#allocation8] sm:$0x1] %vm634_vm13, %v633_v61 }
 0x61c PF: > { %p744_p7 = scmp.eq.s32.totalorder %s703_s18, 2  ;;  %s645_s23 = sshll.u32 %s1038_s4, 4  ;;  %s646_s23 = int_to_ptr.hbm [resolvable:$true] %s645_s23 }
 0x61d   : > { %s867_s24 = smov [#allocation8]  }
 0x61e   : > { %s643_s25 = sshll.u32 %s867_s24, 4  ;;  %s644_s25 = int_to_ptr.vmem [resolvable:$true] %s643_s25 }
 0x61f   : > { %741 = dma.vmem_to_hbm [thread:$0]  (%p744_p7), %s644_s25, 16, %s646_s23, [#allocation9]  }
 0x620   : > { %841 = dma.done.wait (%p744_p7), [#allocation9], 16  }
 0x621   : > { %843 = vsyncadd (%p744_p7), [#allocation9], 4294967280 }
 0x622 PF: > { %s15_s17 = sadd.s32 1, %s854_s17   ;;  %s1039_s15 = smov %s850_s16 }
 0x623   : > { %p12_p8 = scmp.ge.s32.totalorder %s15_s17, 5   ;;  %s1040_s16 = smov %s1042_s19 }
 0x625   :  { %14 = sbr.rel (!%p12_p8) target bundleno = 2 (0x2), region = 88 }
 0x62a   :  { %659 = vsyncpa [#allocation9], 1 }
 0x62b   :  { %661 = vsyncpa [#allocation9 + $0x1], 1 }

</bundles_post_ra>
